<compile_context>
chip_gen: v7x
topology: tpu7x:2x2x1
jax: 0.10.0
libtpu: 0.0.40
codegen_flags: <defaults>
</compile_context>

<pallas_src>
import jax
import jax.numpy as jnp
from jax import lax
from jax.experimental import pallas as pl
from jax.experimental.pallas import tpu as pltpu


def _round_up(x, m):
    return (x + m - 1) // m * m


# ------------------------- Pallas kernel (hot path) -------------------------

def _conv_mm_relu_kernel(p_ref, w_ref, b_ref, o_ref):
    # One (tm, OC) output tile: bf16 MXU matmul, f32 accumulate, +bias, ReLU.
    acc = jnp.dot(p_ref[...], w_ref[...], preferred_element_type=jnp.float32)
    acc = acc + b_ref[...]                      # (1, OC) broadcasts over rows
    o_ref[...] = jnp.maximum(acc, 0.0).astype(o_ref.dtype)


def matmul_bias_relu(patches, weight, bias):
    """ReLU(patches @ weight + bias) on the MXU.

    patches: [M, K] bf16, weight: [K, OC] bf16, bias: [OC] f32 -> [M, OC] f32.
    """
    M, K = patches.shape
    K2, OC = weight.shape
    assert K == K2

    # Lane-dense output: OC in {128, 256, 512} is already a 128-multiple; pad
    # defensively otherwise (padded columns are sliced off below).
    OCp = _round_up(OC, 128)
    if OCp != OC:
        weight = jnp.pad(weight, ((0, 0), (0, OCp - OC)))
        bias = jnp.pad(bias, ((0, OCp - OC),))
    bias2d = bias.reshape(1, OCp).astype(jnp.float32)

    # M tiling: big tiles (<=512 rows) for mem-bound efficiency, but keep >=2
    # blocks along the parallel axis when possible (v7x has 2 TensorCores).
    m8 = _round_up(max(M, 8), 8)
    n_blocks = pl.cdiv(m8, 512)
    if n_blocks < 2 and m8 >= 16:
        n_blocks = 2
    tm = _round_up(pl.cdiv(m8, n_blocks), 8)
    Mp = _round_up(M, tm)
    if Mp != M:
        patches = jnp.pad(patches, ((0, Mp - M), (0, 0)))
    grid_m = Mp // tm

    # VMEM budget: double-buffered patches/output tiles + resident weight/bias
    # (counted x2 conservatively), with headroom. Safe on v7x's 64 MiB VMEM.
    vmem_needed = (2 * tm * K * 2) + 2 * (K * OCp * 2) + 2 * (OCp * 4) \
                  + (2 * tm * OCp * 4)
    vmem_limit = int(min(max(2 * vmem_needed, 16 << 20), 48 << 20))
    # TODO(synk): for very large K (big Cin), add a K grid axis marked
    # "arbitrary" with an f32 VMEM accumulator instead of a full-K block.

    out = pl.pallas_call(
        _conv_mm_relu_kernel,
        out_shape=jax.ShapeDtypeStruct((Mp, OCp), jnp.float32),
        grid_spec=pltpu.PrefetchScalarGridSpec(
            num_scalar_prefetch=0,
            grid=(grid_m,),
            in_specs=[
                # patches tile: true (un-padded) K as the full block extent.
                pl.BlockSpec((tm, K), lambda i: (i, 0)),
                # weight / bias: constant index -> DMA'd once, VMEM-resident.
                pl.BlockSpec((K, OCp), lambda i: (0, 0)),
                pl.BlockSpec((1, OCp), lambda i: (0, 0)),
            ],
            out_specs=pl.BlockSpec((tm, OCp), lambda i: (i, 0)),
        ),
        compiler_params=pltpu.CompilerParams(
            dimension_semantics=("parallel",),
            vmem_limit_bytes=vmem_limit),
    )(patches, weight, bias2d)
    return out[:M, :OC]


# ----------------------------- glue (plain JAX) ------------------------------

def cnn_layer_forward(x, x_lens, weight, bias, *, stride, padding):
    """Equivalent of CNNLayer.forward (inference): pad -> conv -> relu."""
    SH, SW = stride
    wl, wr, ht, hb = padding  # F.pad convention: (W_left, W_right, H_top, H_bot)
    x_pad = jnp.pad(x, ((0, 0), (0, 0), (ht, hb), (wl, wr)))
    OC, Cin, KH, KW = weight.shape
    N = x.shape[0]
    K = Cin * KH * KW

    # bf16 operands for the MXU path (accumulation stays f32 in the kernel).
    x_bf16 = x_pad.astype(jnp.bfloat16)

    # Single fused XLA patch-extraction op, channels-last output:
    #   [N, OH, OW, Cin*KH*KW], feature order (c, kh, kw) == OIHW flattening.
    patches = lax.conv_general_dilated_patches(
        x_bf16, (KH, KW), (SH, SW), "VALID",
        dimension_numbers=("NCHW", "OIHW", "NHWC"))
    OH, OW = patches.shape[1], patches.shape[2]
    p2d = patches.reshape(N * OH * OW, K)

    w2d = weight.reshape(OC, K).T.astype(jnp.bfloat16)          # [K, OC]
    out = matmul_bias_relu(p2d, w2d, bias.astype(jnp.float32))  # [M, OC] f32

    # Kernel output is lane-dense NHWC-flat; transpose only because the module
    # contract returns NCHW (an NHWC consumer could skip this).
    y = out.reshape(N, OH, OW, OC).transpose(0, 3, 1, 2)
    # Matches the module exactly (hard-coded stride-2 / padding length update).
    y_lens = (x_lens - 1) // 2 + 1
    return y, y_lens


# --------------------------------- main --------------------------------------

if __name__ == "__main__":
    key = jax.random.PRNGKey(0)
    kx, kw, kb = jax.random.split(key, 3)

    # Module hyperparameters (out_channels must be in {128, 256, 512}).
    N, Cin, H, W = 2, 4, 16, 16
    OC, KH, KW = 128, 3, 3
    SH, SW = 2, 2
    padding = (1, 1, 1, 1)

    # Deterministic inputs / parameters.
    x = jax.random.normal(kx, (N, Cin, H, W), dtype=jnp.float32)
    x_lens = jnp.array([16, 12], dtype=jnp.int32)
    weight = jax.random.normal(kw, (OC, Cin, KH, KW), dtype=jnp.float32) * 0.05
    bias = jax.random.normal(kb, (OC,), dtype=jnp.float32) * 0.05

    y, y_lens = cnn_layer_forward(
        x, x_lens, weight, bias, stride=(SH, SW), padding=padding)
    y = jax.block_until_ready(y)
    y_lens = jax.block_until_ready(y_lens)

    # Reference: XLA conv with the same bf16 operand quantization and f32
    # accumulation, + bias + relu.
    wl, wr, ht, hb = padding
    x_pad = jnp.pad(x, ((0, 0), (0, 0), (ht, hb), (wl, wr)))
    ref = lax.conv_general_dilated(
        x_pad.astype(jnp.bfloat16), weight.astype(jnp.bfloat16),
        window_strides=(SH, SW), padding="VALID",
        dimension_numbers=("NCHW", "OIHW", "NCHW"),
        preferred_element_type=jnp.float32) + bias.reshape(1, OC, 1, 1)
    ref = jnp.maximum(ref, 0.0)
    ref_lens = (x_lens - 1) // 2 + 1

    assert y.shape == (N, OC, 8, 8), y.shape
    assert y.dtype == jnp.float32, y.dtype
    assert jnp.allclose(y, ref, atol=1e-2, rtol=1e-2), \
        float(jnp.max(jnp.abs(y - ref)))
    assert jnp.array_equal(y_lens, ref_lens), "x_lens mismatch"
    print("KERNEL_OK")
</pallas_src>

<mosaic_0001>
module attributes {stable_mosaic.version = 11 : i64} {
  func.func @_conv_mm_relu_kernel(%arg0: i32, %arg1: memref<64x36xbf16, #tpu.memory_space<vmem>>, %arg2: memref<36x128xbf16, #tpu.memory_space<vmem>>, %arg3: memref<1x128xf32, #tpu.memory_space<vmem>>, %arg4: memref<64x128xf32, #tpu.memory_space<vmem>>) attributes {dimension_semantics = [#tpu.dimension_semantics<parallel>], iteration_bounds = array<i64: 2>, scalar_prefetch = 0 : i64, scratch_operands = 0 : i64, tpu.core_type = #tpu.core_type<tc>, window_params = [{transform_indices = @transform_0, window_bounds = array<i64: 64, 36>}, {pipeline_mode = #tpu.pipeline_mode<synchronous>, transform_indices = @transform_1, window_bounds = array<i64: 36, 128>}, {pipeline_mode = #tpu.pipeline_mode<synchronous>, transform_indices = @transform_2, window_bounds = array<i64: 1, 128>}, {transform_indices = @transform_3, window_bounds = array<i64: 64, 128>}]} {
    %c0 = arith.constant 0 : index
    %c0_0 = arith.constant 0 : index
    %0 = vector.load %arg1[%c0, %c0_0] : memref<64x36xbf16, #tpu.memory_space<vmem>>, vector<64x36xbf16>
    %c0_1 = arith.constant 0 : index
    %c0_2 = arith.constant 0 : index
    %1 = vector.load %arg2[%c0_1, %c0_2] : memref<36x128xbf16, #tpu.memory_space<vmem>>, vector<36x128xbf16>
    %cst = arith.constant dense<0.000000e+00> : vector<64x128xf32>
    %2 = tpu.matmul %0, %1, %cst {dimension_numbers = #tpu.dot_dimension_numbers<[1], [0], [0], [1], [0, 0, 1, 1], [], []>} : vector<64x36xbf16>, vector<36x128xbf16>, vector<64x128xf32> -> vector<64x128xf32>
    %c0_3 = arith.constant 0 : index
    %c0_4 = arith.constant 0 : index
    %3 = vector.load %arg3[%c0_3, %c0_4] : memref<1x128xf32, #tpu.memory_space<vmem>>, vector<1x128xf32>
    %4 = vector.broadcast %3 : vector<1x128xf32> to vector<64x128xf32>
    %5 = arith.addf %2, %4 : vector<64x128xf32>
    %cst_5 = arith.constant 0.000000e+00 : f32
    %6 = vector.broadcast %cst_5 : f32 to vector<64x128xf32>
    %7 = arith.maximumf %5, %6 : vector<64x128xf32>
    %c0_6 = arith.constant 0 : index
    %c0_7 = arith.constant 0 : index
    %8 = vector.load %arg4[%c0_6, %c0_7] : memref<64x128xf32, #tpu.memory_space<vmem>>, vector<64x128xf32>
    tpu.vector_store %arg4[%c0_6, %c0_7], %7 {strides = array<i32>} : memref<64x128xf32, #tpu.memory_space<vmem>>, vector<64x128xf32>,
    return
  }
  func.func @transform_0(%arg0: i32) -> (i32, i32) {
    %c0_i32 = arith.constant 0 : i32
    %c0_i32_0 = arith.constant 0 : i32
    return %arg0, %c0_i32 : i32, i32
  }
  func.func @transform_1(%arg0: i32) -> (i32, i32) {
    %c0_i32 = arith.constant 0 : i32
    %c0_i32_0 = arith.constant 0 : i32
    %c0_i32_1 = arith.constant 0 : i32
    return %c0_i32, %c0_i32_0 : i32, i32
  }
  func.func @transform_2(%arg0: i32) -> (i32, i32) {
    %c0_i32 = arith.constant 0 : i32
    %c0_i32_0 = arith.constant 0 : i32
    %c0_i32_1 = arith.constant 0 : i32
    return %c0_i32, %c0_i32_0 : i32, i32
  }
  func.func @transform_3(%arg0: i32) -> (i32, i32) {
    %c0_i32 = arith.constant 0 : i32
    %c0_i32_0 = arith.constant 0 : i32
    return %arg0, %c0_i32 : i32, i32
  }
}

</mosaic_0001>

<bundles_post_ra>
// kernel: tpu_custom_call.1
= control target key start
LH: loop header
LB: loop body
LE: loop exit
PB: predicated region body
PF: predicated region fallthrough
CT: control target
= control target key end

     0   :  { %8 = vsyncpa [#allocation3], 0  ;;  %s709_s0 = inlined_call_operand.vmem [shape: bf16[128,36], index: 0, kind: input, shape index: {}]   ;;  %s710_s1 = inlined_call_operand.vmem [shape: bf16[36,128], index: 1, kind: input, shape index: {}]   ;;  %s711_s2 = inlined_call_operand.vmem [shape: f32[1,128], index: 2, kind: input, shape index: {}]   ;;  %s712_s3 = inlined_call_operand.hbm [shape: f32[128,128], index: 3, kind: output, shape index: {}]  }
   0x1   :  { %10 = vsyncpa [#allocation3 + $0x1], 0  ;;  %s591_s12 = smov 0   ;;  %s593_s13 = smov 0  }
   0x2   :  { %s595_s14 = smov 0   ;;  %s597_s15 = smov 0  }
   0x3 LB: > { %s612_s16 = sadd.s32 4294967295, %s566_s15   ;;  %s402_s17 = sadd.s32 4294967294, %s566_s15   ;;  %s566_s15 = sphi %s597_s15, %s718_s15   ;;  %s562_s14 = sphi %s595_s14, %s717_s14   ;;  %s558_s13 = sphi %s593_s13, %s716_s13   ;;  %s554_s12 = sphi %s591_s12, %s715_s12  }
   0x4   : > { %s616_s18 = sadd.s32 1, %s566_s15   ;;  %s91_s19 = sadd.s32 1, %s562_s14 }
   0x5   : > { %s88_s20 = ssub.s32 %s566_s15, %s616_s18  ;;  %p101_p0 = scmp.ne.s32.totalorder %s562_s14, %s558_s13 }
   0x6   : > { %p89_p1 = scmp.eq.s32.totalorder %s88_s20, 0  ;;  %p102_p2 = scmp.eq.s32.totalorder %s612_s16, 1 }
   0x7   : > { %p107_p3 = scmp.ne.s32.totalorder %s558_s13, %s554_s12  ;;  %p108_p4 = scmp.eq.s32.totalorder %s402_s17, 1 }
   0x8   : > { %s627_s21 = scalar_select %p89_p1, %s562_s14, %s91_s19  }
   0x9   : > { %p629_p5 = por %p102_p2, %p101_p0  ;;  %p633_p6 = por %p108_p4, %p107_p3 }
   0xa   : > { %p405_p7 = scmp.ge.s32.totalorder %s566_s15, 1  ;;  %p141_p8 = scmp.lt.s32.totalorder %s566_s15, 3 }
   0xc   : > { %p142_p9 = pnand %p405_p7, %p141_p8 }
   0xd   : > { %v497_v0 = vld [vmem:[%s710_s1] sm:$0xff] (!%p142_p9)   ;;  %v498_v1 = vld [vmem:[%s710_s1 + $0x8] sm:$0xff] (!%p142_p9)   ;;  %s407_s28 = sshll.u32 (!%p142_p9), %s612_s16, 3  ;;  %v499_v2 = vld [vmem:[%s710_s1 + $0x10] ss:$0 sps:$4 sm:$0x33] (!%p142_p9)  }
   0xe   : > { %145 = sbr.rel (%p142_p9) target bundleno = 260 (0x104), region = 32  ;;  %434 = vmatprep.subr.bf16.mxu0 (!%p142_p9), %v497_v0  ;;  %448 = vmatprep.subr.bf16.mxu1 (!%p142_p9), %v497_v0  ;;  %p166_p10 = scmp.lt.s32.totalorder (!%p142_p9), %s407_s28, 15  ;;  %vm241_vm0 = vcmask (!%p142_p9), 1041408   ;;  %vm228_vm1 = vcmask (!%p142_p9), 293888   ;;  %v409_v8 = vld [vmem:[%s711_s2] ss:$0 sm:$0xff] (!%p142_p9) }
   0xf   : > { %435 = vmatpush3.bf16.msra.mxu0 (!%p142_p9), %v497_v0  ;;  %451 = vmatpush3.bf16.msra.mxu1 (!%p142_p9), %v497_v0  ;;  %v243_v3 = vsel (!%p142_p9), %vm241_vm0, %v499_v2, 0  ;;  %s162_s8 = sand.u32 (!%p142_p9), 1, %s558_s13   ;;  %s426_s17 = sshll.u32 (!%p142_p9), %s612_s16, 10 }
  0x10   : > { %436 = vmatprep.subr.bf16.mxu0 (!%p142_p9), %v498_v1  ;;  %449 = vmatprep.subr.bf16.mxu1 (!%p142_p9), %v498_v1  ;;  %s406_s9 = sshll.u32 (!%p142_p9), %s162_s8, 6  ;;  %s662_s25 = scalar_lea.hbm (!%p142_p9), %s712_s3, %s426_s17 }
  0x11   : > { %s164_s19 = scalar_lea.vmem (!%p142_p9), [#allocation2], %s406_s9  ;;  %s668_s26 = scalar_lea.sflag (!%p142_p9), [#allocation3], %s162_s8 }
  0x12   : > { %s340_s20 = sshll.u32 (!%p142_p9), %s164_s19, 4  ;;  %s664_s20 = int_to_ptr.vmem [resolvable:$true] %s340_s20 }
  0x13   : > { %437 = vmatpush3.bf16.msra.mxu0 (!%p142_p9), %v498_v1  ;;  %452 = vmatpush3.bf16.msra.mxu1 (!%p142_p9), %v498_v1  ;;  %s504_s27 = scalar_lea.vmem (!%p142_p9), %s664_s20, 1024 }
  0x14   : > { %454 = vmatprep.subr.msk.bf16.mxu0 (!%p142_p9), %vm241_vm0, %v499_v2  ;;  %455 = vmatprep.subr.msk.bf16.mxu1 (!%p142_p9), %vm241_vm0, %v499_v2  ;;  %p505_p11 = scmp.ne.s32.totalorder (!%p142_p9), %s664_s20, %s504_s27 }
  0x15   : > { %s720_s28 = smov (!%p166_p10, %s407_s28), 15 }
  0x16   : > { %s408_s4 = sshll.u32 %s720_s28, 2  ;;  %p506_p12 = pnand %p505_p11, %p629_p5 }
  0x17   : > { %s169_s7 = scalar_lea.vmem %s709_s0, %s408_s4  ;;  %439 = vmatpush3.bf16.msra.mxu0 %v243_v3  ;;  %453 = vmatpush3.bf16.msra.mxu1 %v243_v3  ;;  %s568_s28 = smov [#allocation2]  }
  0x18   : > { %v500_v4 = vld [vmem:[%s169_s7] sm:$0xff]   ;;  %v501_v5 = vld [vmem:[%s169_s7 + $0x10] sm:$0xff]   ;;  %v502_v6 = vld [vmem:[%s169_s7 + $0x8] sm:$0xff]   ;;  %p507_p13 = pneg %p506_p12  ;;  %s508_s29 = sshll.u32 %s568_s28, 4  ;;  %s509_s29 = int_to_ptr.vmem [resolvable:$false] %s508_s29 }
  0x19   : > { %440 = vmatprep.mubr.msk.bf16.mxu0 %vm228_vm1, %v500_v4  ;;  %v503_v7 = vld [vmem:[%s169_s7 + $0x18] sm:$0xff]   ;;  %444 = vmatprep.mubr.msk.bf16.mxu1 %vm228_vm1, %v501_v5  ;;  %s510_s30 = scalar_lea.vmem %s509_s29, 2048  ;;  %p511_p0 = scmp.lt.s32.totalorder %s664_s20, %s509_s29 }
  0x1a   : > { %441 = vmatmul.mubr.msk.bf16.vlgmr.msra.gmra.mrb[0].mxu0 %vm228_vm1, %v502_v6  ;;  %445 = vmatmul.mubr.msk.bf16.vlgmr.msra.gmra.mrb[0].mxu1 %vm228_vm1, %v503_v7  ;;  %p512_p1 = scmp.lt.s32.totalorder %s510_s30, %s504_s27 }
  0x1c   : > { %p513_p2 = por %p512_p1, %p511_p0 }
  0x1e   : > { %p514_p3 = pnand %p513_p2, %p507_p13 }
  0xed   : > { %v442_v9 = vpop.f32.mrb[0].mxu0  ;;  %v446_v10 = vpop.f32.mrb[0].mxu1 }
  0xee   : > { %v288_v11 = vadd.f32 %v442_v9, %v409_v8  ;;  %v304_v12 = vadd.f32 %v446_v10, %v409_v8  ;;  %v279_v13 = vpop.f32.mrb[1].mxu0  ;;  %v295_v14 = vpop.f32.mrb[1].mxu1 }
  0xef   : > { %v280_v15 = vadd.f32 %v409_v8, %v279_v13  ;;  %v296_v16 = vadd.f32 %v409_v8, %v295_v14  ;;  %v443_v17 = vpop.f32.mrb[2].mxu0  ;;  %v447_v18 = vpop.f32.mrb[2].mxu1 }
  0xf0   : > { %v312_v19 = vmax.f32 %v288_v11, 0.0  ;;  %v316_v20 = vmax.f32 %v304_v12, 0.0  ;;  %v291_v21 = vadd.f32 %v443_v17, %v409_v8  ;;  %v307_v22 = vadd.f32 %v447_v18, %v409_v8  ;;  %v282_v23 = vpop.f32.mrb[3].mxu0  ;;  %v298_v24 = vpop.f32.mrb[3].mxu1 }
  0xf1   : > { %v310_v25 = vmax.f32 %v280_v15, 0.0  ;;  %v314_v26 = vmax.f32 %v296_v16, 0.0  ;;  %v283_v27 = vadd.f32 %v409_v8, %v282_v23  ;;  %v299_v28 = vadd.f32 %v409_v8, %v298_v24 }
  0xf2   : > { %320 = vst [vmem:[%s164_s19 + $0x10] sm:$0xff] %v312_v19  ;;  %324 = vst [vmem:[%s164_s19 + $0x30] sm:$0xff] %v316_v20  ;;  %v313_v29 = vmax.f32 %v291_v21, 0.0  ;;  %v317_v30 = vmax.f32 %v307_v22, 0.0 }
  0xf3   : > { %318 = vst [vmem:[%s164_s19] sm:$0xff] %v310_v25  ;;  %322 = vst [vmem:[%s164_s19 + $0x20] sm:$0xff] %v314_v26  ;;  %v311_v31 = vmax.f32 %v283_v27, 0.0  ;;  %v315_v32 = vmax.f32 %v299_v28, 0.0 }
  0xf4   : > { %321 = vst [vmem:[%s164_s19 + $0x18] sm:$0xff] %v313_v29  ;;  %325 = vst [vmem:[%s164_s19 + $0x38] sm:$0xff] %v317_v30 }
  0xf5   : > { %319 = vst [vmem:[%s164_s19 + $0x8] sm:$0xff] %v311_v31  ;;  %323 = vst [vmem:[%s164_s19 + $0x28] sm:$0xff] %v315_v32 }
  0xf6   : > { %517 = shalt.err (!%p514_p3)
}
  0xf7   : > { %s518_s4 = scalar_lea.hbm %s662_s25, 1024  ;;  %s522_s7 = scalar_lea.hbm %s712_s3, 2048 }
  0xf8   : > { %p519_p4 = scmp.ne.s32.totalorder %s662_s25, %s518_s4  ;;  %p523_p9 = scmp.lt.u32.totalorder %s662_s25, %s712_s3 }
  0xf9   : > { %p524_p10 = scmp.lt.u32.totalorder %s522_s7, %s518_s4  ;;  %p526_p12 = scmp.lt.u32.totalorder %s518_s4, %s662_s25 }
  0xfa   : > { %p520_p7 = pnand %p519_p4, %p629_p5 }
  0xfb   : > { %p525_p11 = por %p524_p10, %p523_p9 }
  0xfc   : > { %p521_p8 = pneg %p520_p7 }
  0xfd   : > { %p527_p13 = por %p526_p12, %p525_p11 }
  0xff   : > { %p528_p0 = pnand %p527_p13, %p521_p8 }
 0x101   : > { %531 = shalt.err (!%p528_p0)
}
 0x102   : > { %s569_s10 = smov 128   ;;  %s570_s11 = smov 8  }
 0x103   : > { %456 = dma.vmem_to_hbm [thread:$0]  (%p629_p5), %s664_s20, 1024, %s662_s25, %s668_s26, %s569_s10, %s569_s10, %s570_s11  }
 0x104 PF: > { %p462_p1 = scmp.ge.s32.totalorder %s566_s15, 2  ;;  %s355_s17 = sand.u32 1, %s554_s12  }
 0x105   : > { %s356_s19 = scalar_lea.sflag [#allocation3], %s355_s17 }
 0x106   : > { %p459_p2 = pnand %p462_p1, %p633_p6 }
 0x108   : > { %549 = dma.done.wait (!%p459_p2), %s356_s19, 1024  }
 0x109   : > { %551 = vsyncadd (!%p459_p2), %s356_s19, 4294966272  ;;  %p13_p3 = scmp.ge.s32.totalorder %s616_s18, 4   ;;  %s715_s12 = smov %s558_s13 }
 0x10a   : > { %s716_s13 = smov %s562_s14  ;;  %s717_s14 = smov %s627_s21 }
 0x10b   : > { %s718_s15 = smov %s616_s18  ;;  %15 = sbr.rel (!%p13_p3) target bundleno = 3 (0x3), region = 67 }
 0x112   :  { %361 = vsyncpa [#allocation3], 1 }
 0x113   :  { %363 = vsyncpa [#allocation3 + $0x1], 1 }

</bundles_post_ra>
